<compile_context>
chip_gen: v7x
topology: tpu7x:2x2x1
jax: 0.10.0
libtpu: 0.0.40
codegen_flags: <defaults>
</compile_context>

<pallas_src>
import functools
import math

import jax
import jax.numpy as jnp
import numpy as np
from jax.experimental import pallas as pl
from jax.experimental.pallas import tpu as pltpu


def _round_up(x, m):
    return ((x + m - 1) // m) * m


def _edge_linear_kernel(xe_ref, w_ref, gathered_ref, o_ref):
    # One edge tile: MXU matmul (tile_e, Fe) @ (Fe, Fout_pad) in f32, then add
    # the precomputed per-edge (sender + receiver + global + bias) term.
    acc = jnp.dot(xe_ref[...], w_ref[...], preferred_element_type=jnp.float32)
    o_ref[...] = (acc + gathered_ref[...]).astype(o_ref.dtype)


@functools.partial(jax.jit, static_argnums=(6, 7))
def _edge_linear_jit(edge_feat, node_feat, glob_feat, senders, receivers,
                     params, num_edges_by_graph, tile_e):
    E, Fe = edge_feat.shape
    _, Fn = node_feat.shape
    G, Fg = glob_feat.shape
    Fout = params["bias"].shape[0]
    out_dtype = edge_feat.dtype

    # ---- project once, then gather per edge (same structure as PyTorch) ----
    p_send = node_feat @ params["W_sender"].T          # (N, Fout)
    p_recv = node_feat @ params["W_receiver"].T        # (N, Fout)
    p_glob = glob_feat @ params["W_global"].T          # (G, Fout)
    edge_graph = jnp.repeat(
        jnp.arange(G, dtype=jnp.int32),
        jnp.asarray(num_edges_by_graph, dtype=jnp.int32),
        total_repeat_length=E)
    # Single fused gather+add producing one (E, Fout) array (bias folded in).
    gathered = (p_send[senders] + p_recv[receivers] + p_glob[edge_graph]
                + params["bias"][None, :])

    # ---- pad to TPU-friendly shapes ----
    tile = max(8, (tile_e // 8) * 8)          # edge-row tile (sublane axis)
    E_p = _round_up(max(E, 1), tile)          # pad ragged edge count
    Fout_p = _round_up(Fout, 128)             # lane-dense output

    we_t = jnp.pad(params["W_edge"].T, ((0, 0), (0, Fout_p - Fout)))     # (Fe, Fout_p)
    xe_p = jnp.pad(edge_feat, ((0, E_p - E), (0, 0)))                    # (E_p, Fe)
    gath_p = jnp.pad(gathered, ((0, E_p - E), (0, Fout_p - Fout)))       # (E_p, Fout_p)

    grid = (E_p // tile,)

    out = pl.pallas_call(
        _edge_linear_kernel,
        out_shape=jax.ShapeDtypeStruct((E_p, Fout_p), out_dtype),
        grid_spec=pltpu.PrefetchScalarGridSpec(
            num_scalar_prefetch=0,
            grid=grid,
            in_specs=[
                pl.BlockSpec((tile, Fe), lambda i: (i, 0)),       # edge rows
                pl.BlockSpec((Fe, Fout_p), lambda i: (0, 0)),     # resident weight
                pl.BlockSpec((tile, Fout_p), lambda i: (i, 0)),   # gathered rows
            ],
            out_specs=pl.BlockSpec((tile, Fout_p), lambda i: (i, 0)),
        ),
        compiler_params=pltpu.CompilerParams(
            dimension_semantics=("parallel",)),   # lets v7x shard edge tiles across its 2 TCs
    )(xe_p, we_t, gath_p)

    return out[:E, :Fout]


def edge_linear(edge_feat, node_feat, glob_feat, senders, receivers,
                num_edges_by_graph, params, *, tile_e=256):
    """Pallas-backed EdgeLinear forward.

    edge_feat: (E, Fe), node_feat: (N, Fn), glob_feat: (G, Fg)
    senders, receivers: (E,) int32 node indices
    num_edges_by_graph: python tuple/list of ints, sums to E (static)
    params: dict with W_edge (Fout,Fe), W_sender (Fout,Fn), W_receiver (Fout,Fn),
            W_global (Fout,Fg), bias (Fout,)
    """
    num_edges_by_graph = tuple(int(n) for n in num_edges_by_graph)
    return _edge_linear_jit(edge_feat, node_feat, glob_feat, senders, receivers,
                            params, num_edges_by_graph, int(tile_e))


def init_params(key, out_features, edge_features, node_features, global_features):
    """Deterministic init matching _reset_parameters:
    weights: kaiming_uniform(a=sqrt(5)) -> U(-1/sqrt(fan_in), 1/sqrt(fan_in))
    bias:    U(-1/sqrt(numel), 1/sqrt(numel))
    """
    ks = jax.random.split(key, 5)

    def w_init(k, fout, fin):
        bound = 1.0 / math.sqrt(fin)
        return jax.random.uniform(k, (fout, fin), jnp.float32, -bound, bound)

    bias_bound = 1.0 / math.sqrt(out_features)
    return {
        "W_edge": w_init(ks[0], out_features, edge_features),
        "W_sender": w_init(ks[1], out_features, node_features),
        "W_receiver": w_init(ks[2], out_features, node_features),
        "W_global": w_init(ks[3], out_features, global_features),
        "bias": jax.random.uniform(ks[4], (out_features,), jnp.float32,
                                   -bias_bound, bias_bound),
    }


def edge_linear_ref(edge_feat, node_feat, glob_feat, senders, receivers,
                    num_edges_by_graph, params):
    """Plain-JAX reference mirroring the PyTorch forward."""
    E = edge_feat.shape[0]
    new_edges = edge_feat @ params["W_edge"].T
    new_edges = new_edges + (node_feat @ params["W_sender"].T)[senders]
    new_edges = new_edges + (node_feat @ params["W_receiver"].T)[receivers]
    edge_graph = jnp.repeat(jnp.arange(len(num_edges_by_graph), dtype=jnp.int32),
                            jnp.asarray(num_edges_by_graph, dtype=jnp.int32),
                            total_repeat_length=E)
    new_edges = new_edges + (glob_feat @ params["W_global"].T)[edge_graph]
    new_edges = new_edges + params["bias"]
    return new_edges


if __name__ == "__main__":
    key = jax.random.PRNGKey(0)
    k_p, k_e, k_n, k_g, k_s, k_r = jax.random.split(key, 6)

    # Small synthetic graph batch: 2 graphs, 32 nodes, 520 edges.
    # E=520 exercises edge-row padding (not a tile multiple) and a >1 grid;
    # Fout=16 exercises the lane padding to 128.
    num_graphs = 2
    num_nodes = 32
    num_edges_by_graph = (270, 250)
    num_edges = sum(num_edges_by_graph)

    edge_features = 8
    node_features = 8
    global_features = 4
    out_features = 16

    params = init_params(k_p, out_features, edge_features, node_features,
                         global_features)

    edge_feat = jax.random.normal(k_e, (num_edges, edge_features), jnp.float32)
    node_feat = jax.random.normal(k_n, (num_nodes, node_features), jnp.float32)
    glob_feat = jax.random.normal(k_g, (num_graphs, global_features), jnp.float32)
    senders = jax.random.randint(k_s, (num_edges,), 0, num_nodes, jnp.int32)
    receivers = jax.random.randint(k_r, (num_edges,), 0, num_nodes, jnp.int32)

    out = edge_linear(edge_feat, node_feat, glob_feat, senders, receivers,
                      num_edges_by_graph, params)
    out = jax.block_until_ready(out)

    ref = edge_linear_ref(edge_feat, node_feat, glob_feat, senders, receivers,
                          num_edges_by_graph, params)
    np.testing.assert_allclose(np.asarray(out), np.asarray(ref),
                               rtol=1e-5, atol=1e-5)
    assert out.shape == (num_edges, out_features)
    print("KERNEL_OK")
</pallas_src>

<mosaic_0001>
module attributes {stable_mosaic.version = 11 : i64} {
  func.func @_edge_linear_kernel(%arg0: i32, %arg1: memref<256x8xf32, #tpu.memory_space<vmem>>, %arg2: memref<8x128xf32, #tpu.memory_space<vmem>>, %arg3: memref<256x128xf32, #tpu.memory_space<vmem>>, %arg4: memref<256x128xf32, #tpu.memory_space<vmem>>) attributes {dimension_semantics = [#tpu.dimension_semantics<parallel>], iteration_bounds = array<i64: 3>, scalar_prefetch = 0 : i64, scratch_operands = 0 : i64, tpu.core_type = #tpu.core_type<tc>, window_params = [{transform_indices = @transform_0, window_bounds = array<i64: 256, 8>}, {pipeline_mode = #tpu.pipeline_mode<synchronous>, transform_indices = @transform_1, window_bounds = array<i64: 8, 128>}, {transform_indices = @transform_2, window_bounds = array<i64: 256, 128>}, {transform_indices = @transform_3, window_bounds = array<i64: 256, 128>}]} {
    %c0 = arith.constant 0 : index
    %c0_0 = arith.constant 0 : index
    %0 = vector.load %arg1[%c0, %c0_0] : memref<256x8xf32, #tpu.memory_space<vmem>>, vector<256x8xf32>
    %c0_1 = arith.constant 0 : index
    %c0_2 = arith.constant 0 : index
    %1 = vector.load %arg2[%c0_1, %c0_2] : memref<8x128xf32, #tpu.memory_space<vmem>>, vector<8x128xf32>
    %cst = arith.constant dense<0.000000e+00> : vector<256x128xf32>
    %2 = tpu.matmul %0, %1, %cst {dimension_numbers = #tpu.dot_dimension_numbers<[1], [0], [0], [1], [0, 0, 1, 1], [], []>} : vector<256x8xf32>, vector<8x128xf32>, vector<256x128xf32> -> vector<256x128xf32>
    %c0_3 = arith.constant 0 : index
    %c0_4 = arith.constant 0 : index
    %3 = vector.load %arg3[%c0_3, %c0_4] : memref<256x128xf32, #tpu.memory_space<vmem>>, vector<256x128xf32>
    %4 = arith.addf %2, %3 : vector<256x128xf32>
    %c0_5 = arith.constant 0 : index
    %c0_6 = arith.constant 0 : index
    %5 = vector.load %arg4[%c0_5, %c0_6] : memref<256x128xf32, #tpu.memory_space<vmem>>, vector<256x128xf32>
    tpu.vector_store %arg4[%c0_5, %c0_6], %4 {strides = array<i32>} : memref<256x128xf32, #tpu.memory_space<vmem>>, vector<256x128xf32>,
    return
  }
  func.func @transform_0(%arg0: i32) -> (i32, i32) {
    %c0_i32 = arith.constant 0 : i32
    %c0_i32_0 = arith.constant 0 : i32
    return %arg0, %c0_i32 : i32, i32
  }
  func.func @transform_1(%arg0: i32) -> (i32, i32) {
    %c0_i32 = arith.constant 0 : i32
    %c0_i32_0 = arith.constant 0 : i32
    %c0_i32_1 = arith.constant 0 : i32
    return %c0_i32, %c0_i32_0 : i32, i32
  }
  func.func @transform_2(%arg0: i32) -> (i32, i32) {
    %c0_i32 = arith.constant 0 : i32
    %c0_i32_0 = arith.constant 0 : i32
    return %arg0, %c0_i32 : i32, i32
  }
  func.func @transform_3(%arg0: i32) -> (i32, i32) {
    %c0_i32 = arith.constant 0 : i32
    %c0_i32_0 = arith.constant 0 : i32
    return %arg0, %c0_i32 : i32, i32
  }
}

</mosaic_0001>

<bundles_post_ra>
// kernel: _edge_linear_jit.1
= control target key start
LH: loop header
LB: loop body
LE: loop exit
PB: predicated region body
PF: predicated region fallthrough
CT: control target
= control target key end

     0   :  { %s849_s12 = smov 0   ;;  %s1011_s0 = inlined_call_operand.vmem [shape: f32[768,8], index: 0, kind: input, shape index: {}]   ;;  %s1012_s1 = inlined_call_operand.vmem [shape: f32[8,128], index: 1, kind: input, shape index: {}]   ;;  %s1013_s2 = inlined_call_operand.vmem [shape: f32[768,128], index: 2, kind: input, shape index: {}]   ;;  %s1014_s3 = inlined_call_operand.vmem [shape: f32[768,128], index: 3, kind: output, shape index: {}]  }
   0x1 LB: > { %s683_s13 = sadd.s32 4294967295, %s827_s12   ;;  %p687_p0 = scmp.ge.s32.totalorder %s827_s12, 1  ;;  %s827_s12 = sphi %s849_s12, %s13_s12  }
   0x2   : > { %p149_p1 = scmp.lt.s32.totalorder %s827_s12, 4 }
   0x4   : > { %p150_p2 = pnand %p687_p0, %p149_p1 }
   0x5   : > { %v228_v0 = vld [vmem:[%s1012_s1] sm:$0xff] (!%p150_p2)  ;;  %s688_s16 = sshll.u32 (!%p150_p2), %s683_s13, 5  ;;  %vm261_vm0 = vcmask (!%p150_p2), 64512  }
   0x6   : > { %153 = sbr.rel (%p150_p2) target bundleno = 263 (0x107), region = 32  ;;  %761 = vmatprep.subr.mxu0 (!%p150_p2), %v228_v0  ;;  %811 = vmatprep.subr.mxu1 (!%p150_p2), %v228_v0  ;;  %p179_p3 = scmp.lt.s32.totalorder (!%p150_p2), %s688_s16, 95 }
   0x7   : > { %762 = vmatpush3.msra.mxu0 (!%p150_p2), %v228_v0  ;;  %812 = vmatpush3.msra.mxu1 (!%p150_p2), %v228_v0 }
   0xd   : > { %s1016_s16 = smov (!%p179_p3, %s688_s16), 95 }
   0xe   : > { %s860_s17 = sshll.u32 %s1016_s16, 3 }
   0xf   : > { %s866_s20 = scalar_lea.vmem %s1011_s0, %s860_s17  ;;  %s936_s23 = scalar_lea.vmem %s1013_s2, %s860_s17 }
  0x10   : > { %v196_v1 = vld [vmem:[%s866_s20] sm:$0xff]  ;;  %v197_v3 = vld [vmem:[%s866_s20 + $0x8] sm:$0xff]  ;;  %v198_v5 = vld [vmem:[%s866_s20 + $0x10] sm:$0xff]  ;;  %s946_s26 = scalar_lea.vmem %s1014_s3, %s860_s17 }
  0x11   : > { %v212_v2 = vld [vmem:[%s866_s20 + $0x80] sm:$0xff]  ;;  %763 = vmatprep.mubr.msk.f32.mxu0 %vm261_vm0, %v196_v1  ;;  %v213_v4 = vld [vmem:[%s866_s20 + $0x88] sm:$0xff]  ;;  %v214_v6 = vld [vmem:[%s866_s20 + $0x90] sm:$0xff] }
  0x12   : > { %787 = vmatprep.mubr.msk.f32.mxu1 %vm261_vm0, %v212_v2  ;;  %764 = vmatmul.mubr.msk.f32.vlgmr.msra.gmra.mrb[0].mxu0 %vm261_vm0, %v197_v3  ;;  %v199_v7 = vld [vmem:[%s866_s20 + $0x18] sm:$0xff]  ;;  %v200_v9 = vld [vmem:[%s866_s20 + $0x20] sm:$0xff]  ;;  %v201_v11 = vld [vmem:[%s866_s20 + $0x28] sm:$0xff] }
  0x13   : > { %788 = vmatmul.mubr.msk.f32.vlgmr.msra.gmra.mrb[0].mxu1 %vm261_vm0, %v213_v4  ;;  %766 = vmatprep.mubr.msk.f32.mxu0 %vm261_vm0, %v198_v5  ;;  %v215_v8 = vld [vmem:[%s866_s20 + $0x98] sm:$0xff]  ;;  %v216_v10 = vld [vmem:[%s866_s20 + $0xa0] sm:$0xff]  ;;  %v217_v12 = vld [vmem:[%s866_s20 + $0xa8] sm:$0xff] }
  0x14   : > { %790 = vmatprep.mubr.msk.f32.mxu1 %vm261_vm0, %v214_v6  ;;  %v202_v13 = vld [vmem:[%s866_s20 + $0x30] sm:$0xff]  ;;  %v203_v15 = vld [vmem:[%s866_s20 + $0x38] sm:$0xff]  ;;  %v204_v17 = vld [vmem:[%s866_s20 + $0x40] sm:$0xff] }
  0x15   : > { %v218_v14 = vld [vmem:[%s866_s20 + $0xb0] sm:$0xff]  ;;  %v219_v16 = vld [vmem:[%s866_s20 + $0xb8] sm:$0xff]  ;;  %v220_v18 = vld [vmem:[%s866_s20 + $0xc0] sm:$0xff] }
  0x16   : > { %767 = vmatmul.mubr.msk.f32.gmra.mrb[2].mxu0 %vm261_vm0, %v199_v7  ;;  %v205_v19 = vld [vmem:[%s866_s20 + $0x48] sm:$0xff]  ;;  %v206_v21 = vld [vmem:[%s866_s20 + $0x50] sm:$0xff]  ;;  %v207_v23 = vld [vmem:[%s866_s20 + $0x58] sm:$0xff] }
  0x17   : > { %791 = vmatmul.mubr.msk.f32.gmra.mrb[2].mxu1 %vm261_vm0, %v215_v8  ;;  %769 = vmatprep.mubr.msk.f32.mxu0 %vm261_vm0, %v200_v9  ;;  %v221_v20 = vld [vmem:[%s866_s20 + $0xc8] sm:$0xff]  ;;  %v222_v22 = vld [vmem:[%s866_s20 + $0xd0] sm:$0xff]  ;;  %v223_v24 = vld [vmem:[%s866_s20 + $0xd8] sm:$0xff] }
  0x18   : > { %793 = vmatprep.mubr.msk.f32.mxu1 %vm261_vm0, %v216_v10  ;;  %v208_v25 = vld [vmem:[%s866_s20 + $0x60] sm:$0xff]  ;;  %v209_v27 = vld [vmem:[%s866_s20 + $0x68] sm:$0xff]  ;;  %v210_v29 = vld [vmem:[%s866_s20 + $0x70] sm:$0xff] }
  0x19   : > { %v224_v26 = vld [vmem:[%s866_s20 + $0xe0] sm:$0xff]  ;;  %v225_v28 = vld [vmem:[%s866_s20 + $0xe8] sm:$0xff]  ;;  %v226_v30 = vld [vmem:[%s866_s20 + $0xf0] sm:$0xff] }
  0x1a   : > { %770 = vmatmul.mubr.msk.f32.gmra.mrb[4].mxu0 %vm261_vm0, %v201_v11  ;;  %v211_v31 = vld [vmem:[%s866_s20 + $0x78] sm:$0xff]  ;;  %v230_v33 = vld [vmem:[%s936_s23 + $0x8] sm:$0xff]  ;;  %v229_v35 = vld [vmem:[%s936_s23] sm:$0xff] }
  0x1b   : > { %794 = vmatmul.mubr.msk.f32.gmra.mrb[4].mxu1 %vm261_vm0, %v217_v12  ;;  %772 = vmatprep.mubr.msk.f32.mxu0 %vm261_vm0, %v202_v13  ;;  %v227_v32 = vld [vmem:[%s866_s20 + $0xf8] sm:$0xff]  ;;  %v246_v34 = vld [vmem:[%s936_s23 + $0x88] sm:$0xff]  ;;  %v245_v36 = vld [vmem:[%s936_s23 + $0x80] sm:$0xff] }
  0x1c   : > { %796 = vmatprep.mubr.msk.f32.mxu1 %vm261_vm0, %v218_v14  ;;  %v232_v45 = vld [vmem:[%s936_s23 + $0x18] sm:$0xff]  ;;  %v231_v47 = vld [vmem:[%s936_s23 + $0x10] sm:$0xff]  ;;  %v234_v57 = vld [vmem:[%s936_s23 + $0x28] sm:$0xff] }
  0x1d   : > { %v248_v46 = vld [vmem:[%s936_s23 + $0x98] sm:$0xff]  ;;  %v247_v48 = vld [vmem:[%s936_s23 + $0x90] sm:$0xff]  ;;  %v250_v58 = vld [vmem:[%s936_s23 + $0xa8] sm:$0xff] }
  0x1e   : > { %773 = vmatmul.mubr.msk.f32.gmra.mrb[6].mxu0 %vm261_vm0, %v203_v15  ;;  %v233_v59 = vld [vmem:[%s936_s23 + $0x20] sm:$0xff]  ;;  %v236_v5 = vld [vmem:[%s936_s23 + $0x38] sm:$0xff]  ;;  %v235_v7 = vld [vmem:[%s936_s23 + $0x30] sm:$0xff] }
  0x1f   : > { %797 = vmatmul.mubr.msk.f32.gmra.mrb[6].mxu1 %vm261_vm0, %v219_v16  ;;  %775 = vmatprep.mubr.msk.f32.mxu0 %vm261_vm0, %v204_v17  ;;  %v249_v60 = vld [vmem:[%s936_s23 + $0xa0] sm:$0xff]  ;;  %v252_v6 = vld [vmem:[%s936_s23 + $0xb8] sm:$0xff]  ;;  %v251_v8 = vld [vmem:[%s936_s23 + $0xb0] sm:$0xff] }
  0x20   : > { %799 = vmatprep.mubr.msk.f32.mxu1 %vm261_vm0, %v220_v18  ;;  %v238_v17 = vld [vmem:[%s936_s23 + $0x48] sm:$0xff] }
  0x21   : > { %v254_v18 = vld [vmem:[%s936_s23 + $0xc8] sm:$0xff] }
  0x22   : > { %776 = vmatmul.mubr.msk.f32.gmra.mrb[8].mxu0 %vm261_vm0, %v205_v19  ;;  %v237_v19 = vld [vmem:[%s936_s23 + $0x40] sm:$0xff] }
  0x23   : > { %800 = vmatmul.mubr.msk.f32.gmra.mrb[8].mxu1 %vm261_vm0, %v221_v20  ;;  %778 = vmatprep.mubr.msk.f32.mxu0 %vm261_vm0, %v206_v21  ;;  %v253_v20 = vld [vmem:[%s936_s23 + $0xc0] sm:$0xff] }
  0x24   : > { %802 = vmatprep.mubr.msk.f32.mxu1 %vm261_vm0, %v222_v22 }
  0x26   : > { %779 = vmatmul.mubr.msk.f32.gmra.mrb[10].mxu0 %vm261_vm0, %v207_v23 }
  0x27   : > { %803 = vmatmul.mubr.msk.f32.gmra.mrb[10].mxu1 %vm261_vm0, %v223_v24  ;;  %781 = vmatprep.mubr.msk.f32.mxu0 %vm261_vm0, %v208_v25 }
  0x28   : > { %805 = vmatprep.mubr.msk.f32.mxu1 %vm261_vm0, %v224_v26 }
  0x2a   : > { %782 = vmatmul.mubr.msk.f32.gmra.mrb[12].mxu0 %vm261_vm0, %v209_v27 }
  0x2b   : > { %806 = vmatmul.mubr.msk.f32.gmra.mrb[12].mxu1 %vm261_vm0, %v225_v28  ;;  %784 = vmatprep.mubr.msk.f32.mxu0 %vm261_vm0, %v210_v29  ;;  %v240_v29 = vld [vmem:[%s936_s23 + $0x58] sm:$0xff] }
  0x2c   : > { %808 = vmatprep.mubr.msk.f32.mxu1 %vm261_vm0, %v226_v30  ;;  %v256_v30 = vld [vmem:[%s936_s23 + $0xd8] sm:$0xff] }
  0x2e   : > { %785 = vmatmul.mubr.msk.f32.gmra.mrb[14].mxu0 %vm261_vm0, %v211_v31  ;;  %v239_v31 = vld [vmem:[%s936_s23 + $0x50] sm:$0xff] }
  0x2f   : > { %809 = vmatmul.mubr.msk.f32.gmra.mrb[14].mxu1 %vm261_vm0, %v227_v32  ;;  %v255_v32 = vld [vmem:[%s936_s23 + $0xd0] sm:$0xff] }
  0xe5   : > { %v765_v37 = vpop.f32.mrb[0].mxu0 }
  0xe6   : > { %v789_v38 = vpop.f32.mrb[0].mxu1  ;;  %v430_v39 = vadd.f32 %v765_v37, %v230_v33  ;;  %v424_v41 = vpop.f32.mrb[1].mxu0 }
  0xe7   : > { %v510_v40 = vadd.f32 %v789_v38, %v246_v34  ;;  %v504_v42 = vpop.f32.mrb[1].mxu1  ;;  %v425_v43 = vadd.f32 %v424_v41, %v229_v35  ;;  %v242_v41 = vld [vmem:[%s936_s23 + $0x68] sm:$0xff] }
  0xe8   : > { %v505_v44 = vadd.f32 %v504_v42, %v245_v36  ;;  %584 = vst [vmem:[%s946_s26 + $0x8] sm:$0xff] %v430_v39  ;;  %v258_v42 = vld [vmem:[%s936_s23 + $0xe8] sm:$0xff] }
  0xe9   : > { %600 = vst [vmem:[%s946_s26 + $0x88] sm:$0xff] %v510_v40  ;;  %583 = vst [vmem:[%s946_s26] sm:$0xff] %v425_v43  ;;  %v768_v49 = vpop.f32.mrb[2].mxu0  ;;  %v241_v43 = vld [vmem:[%s936_s23 + $0x60] sm:$0xff] }
  0xea   : > { %599 = vst [vmem:[%s946_s26 + $0x80] sm:$0xff] %v505_v44  ;;  %v792_v50 = vpop.f32.mrb[2].mxu1  ;;  %v440_v51 = vadd.f32 %v768_v49, %v232_v45  ;;  %v434_v53 = vpop.f32.mrb[3].mxu0  ;;  %v257_v44 = vld [vmem:[%s936_s23 + $0xe0] sm:$0xff] }
  0xeb   : > { %v520_v52 = vadd.f32 %v792_v50, %v248_v46  ;;  %v514_v54 = vpop.f32.mrb[3].mxu1  ;;  %v435_v55 = vadd.f32 %v434_v53, %v231_v47  ;;  %v244_v53 = vld [vmem:[%s936_s23 + $0x78] sm:$0xff] }
  0xec   : > { %v515_v56 = vadd.f32 %v514_v54, %v247_v48  ;;  %586 = vst [vmem:[%s946_s26 + $0x18] sm:$0xff] %v440_v51  ;;  %v260_v54 = vld [vmem:[%s936_s23 + $0xf8] sm:$0xff] }
  0xed   : > { %602 = vst [vmem:[%s946_s26 + $0x98] sm:$0xff] %v520_v52  ;;  %585 = vst [vmem:[%s946_s26 + $0x10] sm:$0xff] %v435_v55  ;;  %v771_v61 = vpop.f32.mrb[4].mxu0  ;;  %v243_v55 = vld [vmem:[%s936_s23 + $0x70] sm:$0xff] }
  0xee   : > { %601 = vst [vmem:[%s946_s26 + $0x90] sm:$0xff] %v515_v56  ;;  %v795_v62 = vpop.f32.mrb[4].mxu1  ;;  %v450_v63 = vadd.f32 %v771_v61, %v234_v57  ;;  %v444_v1 = vpop.f32.mrb[5].mxu0  ;;  %v259_v56 = vld [vmem:[%s936_s23 + $0xf0] sm:$0xff] }
  0xef   : > { %v530_v0 = vadd.f32 %v795_v62, %v250_v58  ;;  %v524_v2 = vpop.f32.mrb[5].mxu1  ;;  %v445_v3 = vadd.f32 %v444_v1, %v233_v59 }
  0xf0   : > { %v525_v4 = vadd.f32 %v524_v2, %v249_v60  ;;  %588 = vst [vmem:[%s946_s26 + $0x28] sm:$0xff] %v450_v63 }
  0xf1   : > { %604 = vst [vmem:[%s946_s26 + $0xa8] sm:$0xff] %v530_v0  ;;  %587 = vst [vmem:[%s946_s26 + $0x20] sm:$0xff] %v445_v3  ;;  %v774_v9 = vpop.f32.mrb[6].mxu0 }
  0xf2   : > { %603 = vst [vmem:[%s946_s26 + $0xa0] sm:$0xff] %v525_v4  ;;  %v798_v10 = vpop.f32.mrb[6].mxu1  ;;  %v460_v11 = vadd.f32 %v774_v9, %v236_v5  ;;  %v454_v13 = vpop.f32.mrb[7].mxu0 }
  0xf3   : > { %v540_v12 = vadd.f32 %v798_v10, %v252_v6  ;;  %v534_v14 = vpop.f32.mrb[7].mxu1  ;;  %v455_v15 = vadd.f32 %v454_v13, %v235_v7 }
  0xf4   : > { %v535_v16 = vadd.f32 %v534_v14, %v251_v8  ;;  %590 = vst [vmem:[%s946_s26 + $0x38] sm:$0xff] %v460_v11 }
  0xf5   : > { %606 = vst [vmem:[%s946_s26 + $0xb8] sm:$0xff] %v540_v12  ;;  %589 = vst [vmem:[%s946_s26 + $0x30] sm:$0xff] %v455_v15  ;;  %v777_v21 = vpop.f32.mrb[8].mxu0 }
  0xf6   : > { %605 = vst [vmem:[%s946_s26 + $0xb0] sm:$0xff] %v535_v16  ;;  %v801_v22 = vpop.f32.mrb[8].mxu1  ;;  %v470_v23 = vadd.f32 %v777_v21, %v238_v17  ;;  %v464_v25 = vpop.f32.mrb[9].mxu0 }
  0xf7   : > { %v550_v24 = vadd.f32 %v801_v22, %v254_v18  ;;  %v544_v26 = vpop.f32.mrb[9].mxu1  ;;  %v465_v27 = vadd.f32 %v464_v25, %v237_v19 }
  0xf8   : > { %v545_v28 = vadd.f32 %v544_v26, %v253_v20  ;;  %592 = vst [vmem:[%s946_s26 + $0x48] sm:$0xff] %v470_v23 }
  0xf9   : > { %608 = vst [vmem:[%s946_s26 + $0xc8] sm:$0xff] %v550_v24  ;;  %591 = vst [vmem:[%s946_s26 + $0x40] sm:$0xff] %v465_v27  ;;  %v780_v33 = vpop.f32.mrb[10].mxu0 }
  0xfa   : > { %607 = vst [vmem:[%s946_s26 + $0xc0] sm:$0xff] %v545_v28  ;;  %v804_v34 = vpop.f32.mrb[10].mxu1  ;;  %v480_v35 = vadd.f32 %v780_v33, %v240_v29  ;;  %v474_v37 = vpop.f32.mrb[11].mxu0 }
  0xfb   : > { %v560_v36 = vadd.f32 %v804_v34, %v256_v30  ;;  %v554_v38 = vpop.f32.mrb[11].mxu1  ;;  %v475_v39 = vadd.f32 %v474_v37, %v239_v31 }
  0xfc   : > { %v555_v40 = vadd.f32 %v554_v38, %v255_v32  ;;  %594 = vst [vmem:[%s946_s26 + $0x58] sm:$0xff] %v480_v35 }
  0xfd   : > { %610 = vst [vmem:[%s946_s26 + $0xd8] sm:$0xff] %v560_v36  ;;  %593 = vst [vmem:[%s946_s26 + $0x50] sm:$0xff] %v475_v39  ;;  %v783_v45 = vpop.f32.mrb[12].mxu0 }
  0xfe   : > { %609 = vst [vmem:[%s946_s26 + $0xd0] sm:$0xff] %v555_v40  ;;  %v807_v46 = vpop.f32.mrb[12].mxu1  ;;  %v490_v47 = vadd.f32 %v783_v45, %v242_v41  ;;  %v484_v49 = vpop.f32.mrb[13].mxu0 }
  0xff   : > { %v570_v48 = vadd.f32 %v807_v46, %v258_v42  ;;  %v564_v50 = vpop.f32.mrb[13].mxu1  ;;  %v485_v51 = vadd.f32 %v484_v49, %v241_v43 }
 0x100   : > { %v565_v52 = vadd.f32 %v564_v50, %v257_v44  ;;  %596 = vst [vmem:[%s946_s26 + $0x68] sm:$0xff] %v490_v47 }
 0x101   : > { %612 = vst [vmem:[%s946_s26 + $0xe8] sm:$0xff] %v570_v48  ;;  %595 = vst [vmem:[%s946_s26 + $0x60] sm:$0xff] %v485_v51  ;;  %v786_v57 = vpop.f32.mrb[14].mxu0 }
 0x102   : > { %611 = vst [vmem:[%s946_s26 + $0xe0] sm:$0xff] %v565_v52  ;;  %v810_v58 = vpop.f32.mrb[14].mxu1  ;;  %v500_v59 = vadd.f32 %v786_v57, %v244_v53  ;;  %v494_v61 = vpop.f32.mrb[15].mxu0 }
 0x103   : > { %v580_v60 = vadd.f32 %v810_v58, %v260_v54  ;;  %v574_v62 = vpop.f32.mrb[15].mxu1  ;;  %v495_v63 = vadd.f32 %v494_v61, %v243_v55 }
 0x104   : > { %v575_v0 = vadd.f32 %v574_v62, %v259_v56  ;;  %598 = vst [vmem:[%s946_s26 + $0x78] sm:$0xff] %v500_v59 }
 0x105   : > { %614 = vst [vmem:[%s946_s26 + $0xf8] sm:$0xff] %v580_v60  ;;  %597 = vst [vmem:[%s946_s26 + $0x70] sm:$0xff] %v495_v63 }
 0x106   : > { %613 = vst [vmem:[%s946_s26 + $0xf0] sm:$0xff] %v575_v0 }
 0x107 PF: > { %s13_s12 = sadd.s32 1, %s827_s12  }
 0x108   : > { %p10_p4 = scmp.ge.s32.totalorder %s13_s12, 5  }
 0x10a   :  { %12 = sbr.rel (!%p10_p4) target bundleno = 1 (0x1), region = 65 }

</bundles_post_ra>
